<compile_context>
chip_gen: v7x
topology: tpu7x:2x2x1
jax: 0.10.0
libtpu: 0.0.40
codegen_flags: <defaults>
</compile_context>

<pallas_src>
import jax
import jax.numpy as jnp
from jax import lax
from jax.experimental import pallas as pl
from jax.experimental.pallas import tpu as pltpu


def _rnn_kernel(x_ref, wih_t_ref, whh_t_ref, out_ref, hn_ref):
    """Single-invocation tanh-RNN forward, projection + recurrence fused.

    x_ref    : (B, S, D_in)  batch-first input
    wih_t_ref: (D_in, H)     W_ih^T  (so xw_t = x_t @ wih_t)
    whh_t_ref: (H, H)        W_hh^T  (so h_new = tanh(xw_t + h @ whh_t))
    out_ref  : (B, S, H)     hidden state for every timestep (x dtype)
    hn_ref   : (1, B, H)     final hidden state, float32
    """
    B, S, D_in = x_ref.shape
    H = whh_t_ref.shape[0]

    x = x_ref[...].astype(jnp.float32)        # load once, (B, S, D_in)
    wih_t = wih_t_ref[...]                    # (D_in, H), f32
    whh_t = whh_t_ref[...]                    # (H, H),    f32

    # --- Hoisted input projection for ALL timesteps (VPU-only, exact f32) ---
    # xw[b, s, h] = sum_d x[b, s, d] * W_ih[h, d]
    xw = jnp.zeros((B, S, H), jnp.float32)
    for d in range(D_in):                     # D_in = 3: three mul-adds
        xw = xw + x[:, :, d:d + 1] * wih_t[d:d + 1, :]

    # --- Serial recurrence: only VPU mul/add + tanh per step (no MXU) -------
    h = jnp.zeros((B, H), jnp.float32)        # h_0 = 0
    for t in range(S):                        # S is static -> fully unrolled
        acc = xw[:, t, :]                     # (B, H)
        for i in range(H):                    # H = 4 outer-product terms
            acc = acc + h[:, i:i + 1] * whh_t[i:i + 1, :]
        h = jnp.tanh(acc)
        out_ref[:, t, :] = h.astype(out_ref.dtype)   # VMEM store only

    hn_ref[0, :, :] = h                       # final state, stays f32


def rnn_forward(x_bsd, w_ih, w_hh):
    """x_bsd: (B, S, D_in) batch-first input.
    w_ih: (H, D_in), w_hh: (H, H) — PyTorch nn.RNN parameter layout (no bias).
    Returns (output (B, S, H), h_n (1, B, H)) matching torch.nn.RNN.
    """
    B, S, D_in = x_bsd.shape
    H = w_ih.shape[0]

    # Tiny constant-size weight transposes (so the kernel contracts along the
    # lane axis of the *weight rows*, never reducing along lanes itself).
    wih_t = jnp.transpose(w_ih, (1, 0)).astype(jnp.float32)   # (D_in, H)
    whh_t = jnp.transpose(w_hh, (1, 0)).astype(jnp.float32)   # (H, H)

    vmem = pl.BlockSpec(memory_space=pltpu.MemorySpace.VMEM)
    output, h_n = pl.pallas_call(
        _rnn_kernel,
        out_shape=(
            jax.ShapeDtypeStruct((B, S, H), x_bsd.dtype),
            jax.ShapeDtypeStruct((1, B, H), jnp.float32),
        ),
        in_specs=[vmem, vmem, vmem],
        out_specs=(vmem, vmem),
        # TODO(synk): if shapes scale, add a batch grid axis with
        # dimension_semantics=("parallel",) (v7x 2nd TC) and an explicit
        # vmem_limit_bytes (v5e's 16 MiB default scoped limit).
    )(x_bsd, wih_t, whh_t)

    return output, h_n


def _rnn_reference(x_bsd, w_ih, w_hh):
    """Pure-JAX reference (lax.scan) for correctness check."""
    B = x_bsd.shape[0]

    def step(h, x_t):
        h_new = jnp.tanh(
            jnp.dot(x_t, w_ih.T, precision=lax.Precision.HIGHEST)
            + jnp.dot(h, w_hh.T, precision=lax.Precision.HIGHEST)
        )
        return h_new, h_new

    h0 = jnp.zeros((B, w_ih.shape[0]), jnp.float32)
    x_sbd = jnp.transpose(x_bsd, (1, 0, 2)).astype(jnp.float32)
    h_last, outs = lax.scan(step, h0, x_sbd)
    return jnp.transpose(outs, (1, 0, 2)), h_last[None, :, :]


if __name__ == "__main__":
    # Shapes implied by the module: input_size=3, hidden_size=4.
    B, S, D_in, H = 2, 8, 3, 4

    key = jax.random.PRNGKey(0)
    kx, kih, khh = jax.random.split(key, 3)

    x = jax.random.normal(kx, (B, S, D_in), dtype=jnp.float32)

    # nn.RNN init: U(-1/sqrt(H), 1/sqrt(H)); deterministic synthetic params.
    bound = 1.0 / jnp.sqrt(jnp.float32(H))
    w_ih = jax.random.uniform(kih, (H, D_in), jnp.float32, -bound, bound)
    w_hh = jax.random.uniform(khh, (H, H), jnp.float32, -bound, bound)

    out, h_n = jax.jit(rnn_forward)(x, w_ih, w_hh)
    out = jax.block_until_ready(out)
    h_n = jax.block_until_ready(h_n)

    ref_out, ref_hn = _rnn_reference(x, w_ih, w_hh)
    assert out.shape == (B, S, H) and h_n.shape == (1, B, H)
    assert jnp.allclose(out, ref_out, atol=1e-5, rtol=1e-5)
    assert jnp.allclose(h_n, ref_hn, atol=1e-5, rtol=1e-5)

    print("KERNEL_OK")
</pallas_src>

<mosaic_0001>
module attributes {stable_mosaic.version = 11 : i64} {
  func.func @_rnn_kernel(%arg0: memref<2x8x3xf32, #tpu.memory_space<vmem>>, %arg1: memref<3x4xf32, #tpu.memory_space<vmem>>, %arg2: memref<4x4xf32, #tpu.memory_space<vmem>>, %arg3: memref<2x8x4xf32, #tpu.memory_space<vmem>>, %arg4: memref<1x2x4xf32, #tpu.memory_space<vmem>>) attributes {dimension_semantics = [], scalar_prefetch = 0 : i64, scratch_operands = 0 : i64, tpu.core_type = #tpu.core_type<tc>} {
    %c0 = arith.constant 0 : index
    %c0_0 = arith.constant 0 : index
    %c0_1 = arith.constant 0 : index
    %0 = vector.load %arg0[%c0, %c0_0, %c0_1] : memref<2x8x3xf32, #tpu.memory_space<vmem>>, vector<2x8x3xf32>
    %c0_2 = arith.constant 0 : index
    %c0_3 = arith.constant 0 : index
    %1 = vector.load %arg1[%c0_2, %c0_3] : memref<3x4xf32, #tpu.memory_space<vmem>>, vector<3x4xf32>
    %c0_4 = arith.constant 0 : index
    %c0_5 = arith.constant 0 : index
    %2 = vector.load %arg2[%c0_4, %c0_5] : memref<4x4xf32, #tpu.memory_space<vmem>>, vector<4x4xf32>
    %cst = arith.constant 0.000000e+00 : f32
    %3 = vector.broadcast %cst : f32 to vector<2x8x4xf32>
    %4 = vector.extract_strided_slice %0 {offsets = [0, 0, 0], sizes = [2, 8, 1], strides = [1, 1, 1]} : vector<2x8x3xf32> to vector<2x8x1xf32>
    %5 = vector.extract_strided_slice %1 {offsets = [0, 0], sizes = [1, 4], strides = [1, 1]} : vector<3x4xf32> to vector<1x4xf32>
    %6 = vector.shape_cast %5 : vector<1x4xf32> to vector<1x1x4xf32>
    %7 = vector.broadcast %4 : vector<2x8x1xf32> to vector<2x8x4xf32>
    %8 = vector.broadcast %6 : vector<1x1x4xf32> to vector<2x8x4xf32>
    %9 = arith.mulf %7, %8 : vector<2x8x4xf32>
    %10 = arith.addf %3, %9 : vector<2x8x4xf32>
    %11 = vector.extract_strided_slice %0 {offsets = [0, 0, 1], sizes = [2, 8, 1], strides = [1, 1, 1]} : vector<2x8x3xf32> to vector<2x8x1xf32>
    %12 = vector.extract_strided_slice %1 {offsets = [1, 0], sizes = [1, 4], strides = [1, 1]} : vector<3x4xf32> to vector<1x4xf32>
    %13 = vector.shape_cast %12 : vector<1x4xf32> to vector<1x1x4xf32>
    %14 = vector.broadcast %11 : vector<2x8x1xf32> to vector<2x8x4xf32>
    %15 = vector.broadcast %13 : vector<1x1x4xf32> to vector<2x8x4xf32>
    %16 = arith.mulf %14, %15 : vector<2x8x4xf32>
    %17 = arith.addf %10, %16 : vector<2x8x4xf32>
    %18 = vector.extract_strided_slice %0 {offsets = [0, 0, 2], sizes = [2, 8, 1], strides = [1, 1, 1]} : vector<2x8x3xf32> to vector<2x8x1xf32>
    %19 = vector.extract_strided_slice %1 {offsets = [2, 0], sizes = [1, 4], strides = [1, 1]} : vector<3x4xf32> to vector<1x4xf32>
    %20 = vector.shape_cast %19 : vector<1x4xf32> to vector<1x1x4xf32>
    %21 = vector.broadcast %18 : vector<2x8x1xf32> to vector<2x8x4xf32>
    %22 = vector.broadcast %20 : vector<1x1x4xf32> to vector<2x8x4xf32>
    %23 = arith.mulf %21, %22 : vector<2x8x4xf32>
    %24 = arith.addf %17, %23 : vector<2x8x4xf32>
    %cst_6 = arith.constant 0.000000e+00 : f32
    %25 = vector.broadcast %cst_6 : f32 to vector<2x4xf32>
    %26 = vector.extract_strided_slice %24 {offsets = [0, 0, 0], sizes = [2, 1, 4], strides = [1, 1, 1]} : vector<2x8x4xf32> to vector<2x1x4xf32>
    %27 = vector.shape_cast %26 : vector<2x1x4xf32> to vector<2x4xf32>
    %28 = vector.extract_strided_slice %25 {offsets = [0, 0], sizes = [2, 1], strides = [1, 1]} : vector<2x4xf32> to vector<2x1xf32>
    %29 = vector.extract_strided_slice %2 {offsets = [0, 0], sizes = [1, 4], strides = [1, 1]} : vector<4x4xf32> to vector<1x4xf32>
    %30 = vector.broadcast %28 : vector<2x1xf32> to vector<2x4xf32>
    %31 = vector.broadcast %29 : vector<1x4xf32> to vector<2x4xf32>
    %32 = arith.mulf %30, %31 : vector<2x4xf32>
    %33 = arith.addf %27, %32 : vector<2x4xf32>
    %34 = vector.extract_strided_slice %25 {offsets = [0, 1], sizes = [2, 1], strides = [1, 1]} : vector<2x4xf32> to vector<2x1xf32>
    %35 = vector.extract_strided_slice %2 {offsets = [1, 0], sizes = [1, 4], strides = [1, 1]} : vector<4x4xf32> to vector<1x4xf32>
    %36 = vector.broadcast %34 : vector<2x1xf32> to vector<2x4xf32>
    %37 = vector.broadcast %35 : vector<1x4xf32> to vector<2x4xf32>
    %38 = arith.mulf %36, %37 : vector<2x4xf32>
    %39 = arith.addf %33, %38 : vector<2x4xf32>
    %40 = vector.extract_strided_slice %25 {offsets = [0, 2], sizes = [2, 1], strides = [1, 1]} : vector<2x4xf32> to vector<2x1xf32>
    %41 = vector.extract_strided_slice %2 {offsets = [2, 0], sizes = [1, 4], strides = [1, 1]} : vector<4x4xf32> to vector<1x4xf32>
    %42 = vector.broadcast %40 : vector<2x1xf32> to vector<2x4xf32>
    %43 = vector.broadcast %41 : vector<1x4xf32> to vector<2x4xf32>
    %44 = arith.mulf %42, %43 : vector<2x4xf32>
    %45 = arith.addf %39, %44 : vector<2x4xf32>
    %46 = vector.extract_strided_slice %25 {offsets = [0, 3], sizes = [2, 1], strides = [1, 1]} : vector<2x4xf32> to vector<2x1xf32>
    %47 = vector.extract_strided_slice %2 {offsets = [3, 0], sizes = [1, 4], strides = [1, 1]} : vector<4x4xf32> to vector<1x4xf32>
    %48 = vector.broadcast %46 : vector<2x1xf32> to vector<2x4xf32>
    %49 = vector.broadcast %47 : vector<1x4xf32> to vector<2x4xf32>
    %50 = arith.mulf %48, %49 : vector<2x4xf32>
    %51 = arith.addf %45, %50 : vector<2x4xf32>
    %52 = math.tanh %51 : vector<2x4xf32>
    %c0_7 = arith.constant 0 : index
    %c0_8 = arith.constant 0 : index
    %c0_9 = arith.constant 0 : index
    %53 = vector.load %arg3[%c0_7, %c0_8, %c0_9] : memref<2x8x4xf32, #tpu.memory_space<vmem>>, vector<2x1x4xf32>
    %54 = vector.shape_cast %53 : vector<2x1x4xf32> to vector<2x4xf32>
    %55 = vector.shape_cast %52 : vector<2x4xf32> to vector<2x1x4xf32>
    tpu.vector_store %arg3[%c0_7, %c0_8, %c0_9], %55 {strides = array<i32>} : memref<2x8x4xf32, #tpu.memory_space<vmem>>, vector<2x1x4xf32>,
    %56 = vector.extract_strided_slice %24 {offsets = [0, 1, 0], sizes = [2, 1, 4], strides = [1, 1, 1]} : vector<2x8x4xf32> to vector<2x1x4xf32>
    %57 = vector.shape_cast %56 : vector<2x1x4xf32> to vector<2x4xf32>
    %58 = vector.extract_strided_slice %52 {offsets = [0, 0], sizes = [2, 1], strides = [1, 1]} : vector<2x4xf32> to vector<2x1xf32>
    %59 = vector.extract_strided_slice %2 {offsets = [0, 0], sizes = [1, 4], strides = [1, 1]} : vector<4x4xf32> to vector<1x4xf32>
    %60 = vector.broadcast %58 : vector<2x1xf32> to vector<2x4xf32>
    %61 = vector.broadcast %59 : vector<1x4xf32> to vector<2x4xf32>
    %62 = arith.mulf %60, %61 : vector<2x4xf32>
    %63 = arith.addf %57, %62 : vector<2x4xf32>
    %64 = vector.extract_strided_slice %52 {offsets = [0, 1], sizes = [2, 1], strides = [1, 1]} : vector<2x4xf32> to vector<2x1xf32>
    %65 = vector.extract_strided_slice %2 {offsets = [1, 0], sizes = [1, 4], strides = [1, 1]} : vector<4x4xf32> to vector<1x4xf32>
    %66 = vector.broadcast %64 : vector<2x1xf32> to vector<2x4xf32>
    %67 = vector.broadcast %65 : vector<1x4xf32> to vector<2x4xf32>
    %68 = arith.mulf %66, %67 : vector<2x4xf32>
    %69 = arith.addf %63, %68 : vector<2x4xf32>
    %70 = vector.extract_strided_slice %52 {offsets = [0, 2], sizes = [2, 1], strides = [1, 1]} : vector<2x4xf32> to vector<2x1xf32>
    %71 = vector.extract_strided_slice %2 {offsets = [2, 0], sizes = [1, 4], strides = [1, 1]} : vector<4x4xf32> to vector<1x4xf32>
    %72 = vector.broadcast %70 : vector<2x1xf32> to vector<2x4xf32>
    %73 = vector.broadcast %71 : vector<1x4xf32> to vector<2x4xf32>
    %74 = arith.mulf %72, %73 : vector<2x4xf32>
    %75 = arith.addf %69, %74 : vector<2x4xf32>
    %76 = vector.extract_strided_slice %52 {offsets = [0, 3], sizes = [2, 1], strides = [1, 1]} : vector<2x4xf32> to vector<2x1xf32>
    %77 = vector.extract_strided_slice %2 {offsets = [3, 0], sizes = [1, 4], strides = [1, 1]} : vector<4x4xf32> to vector<1x4xf32>
    %78 = vector.broadcast %76 : vector<2x1xf32> to vector<2x4xf32>
    %79 = vector.broadcast %77 : vector<1x4xf32> to vector<2x4xf32>
    %80 = arith.mulf %78, %79 : vector<2x4xf32>
    %81 = arith.addf %75, %80 : vector<2x4xf32>
    %82 = math.tanh %81 : vector<2x4xf32>
    %c0_10 = arith.constant 0 : index
    %c1 = arith.constant 1 : index
    %c0_11 = arith.constant 0 : index
    %83 = vector.load %arg3[%c0_10, %c1, %c0_11] : memref<2x8x4xf32, #tpu.memory_space<vmem>>, vector<2x1x4xf32>
    %84 = vector.shape_cast %83 : vector<2x1x4xf32> to vector<2x4xf32>
    %85 = vector.shape_cast %82 : vector<2x4xf32> to vector<2x1x4xf32>
    tpu.vector_store %arg3[%c0_10, %c1, %c0_11], %85 {strides = array<i32>} : memref<2x8x4xf32, #tpu.memory_space<vmem>>, vector<2x1x4xf32>,
    %86 = vector.extract_strided_slice %24 {offsets = [0, 2, 0], sizes = [2, 1, 4], strides = [1, 1, 1]} : vector<2x8x4xf32> to vector<2x1x4xf32>
    %87 = vector.shape_cast %86 : vector<2x1x4xf32> to vector<2x4xf32>
    %88 = vector.extract_strided_slice %82 {offsets = [0, 0], sizes = [2, 1], strides = [1, 1]} : vector<2x4xf32> to vector<2x1xf32>
    %89 = vector.extract_strided_slice %2 {offsets = [0, 0], sizes = [1, 4], strides = [1, 1]} : vector<4x4xf32> to vector<1x4xf32>
    %90 = vector.broadcast %88 : vector<2x1xf32> to vector<2x4xf32>
    %91 = vector.broadcast %89 : vector<1x4xf32> to vector<2x4xf32>
    %92 = arith.mulf %90, %91 : vector<2x4xf32>
    %93 = arith.addf %87, %92 : vector<2x4xf32>
    %94 = vector.extract_strided_slice %82 {offsets = [0, 1], sizes = [2, 1], strides = [1, 1]} : vector<2x4xf32> to vector<2x1xf32>
    %95 = vector.extract_strided_slice %2 {offsets = [1, 0], sizes = [1, 4], strides = [1, 1]} : vector<4x4xf32> to vector<1x4xf32>
    %96 = vector.broadcast %94 : vector<2x1xf32> to vector<2x4xf32>
    %97 = vector.broadcast %95 : vector<1x4xf32> to vector<2x4xf32>
    %98 = arith.mulf %96, %97 : vector<2x4xf32>
    %99 = arith.addf %93, %98 : vector<2x4xf32>
    %100 = vector.extract_strided_slice %82 {offsets = [0, 2], sizes = [2, 1], strides = [1, 1]} : vector<2x4xf32> to vector<2x1xf32>
    %101 = vector.extract_strided_slice %2 {offsets = [2, 0], sizes = [1, 4], strides = [1, 1]} : vector<4x4xf32> to vector<1x4xf32>
    %102 = vector.broadcast %100 : vector<2x1xf32> to vector<2x4xf32>
    %103 = vector.broadcast %101 : vector<1x4xf32> to vector<2x4xf32>
    %104 = arith.mulf %102, %103 : vector<2x4xf32>
    %105 = arith.addf %99, %104 : vector<2x4xf32>
    %106 = vector.extract_strided_slice %82 {offsets = [0, 3], sizes = [2, 1], strides = [1, 1]} : vector<2x4xf32> to vector<2x1xf32>
    %107 = vector.extract_strided_slice %2 {offsets = [3, 0], sizes = [1, 4], strides = [1, 1]} : vector<4x4xf32> to vector<1x4xf32>
    %108 = vector.broadcast %106 : vector<2x1xf32> to vector<2x4xf32>
    %109 = vector.broadcast %107 : vector<1x4xf32> to vector<2x4xf32>
    %110 = arith.mulf %108, %109 : vector<2x4xf32>
    %111 = arith.addf %105, %110 : vector<2x4xf32>
    %112 = math.tanh %111 : vector<2x4xf32>
    %c0_12 = arith.constant 0 : index
    %c2 = arith.constant 2 : index
    %c0_13 = arith.constant 0 : index
    %113 = vector.load %arg3[%c0_12, %c2, %c0_13] : memref<2x8x4xf32, #tpu.memory_space<vmem>>, vector<2x1x4xf32>
    %114 = vector.shape_cast %113 : vector<2x1x4xf32> to vector<2x4xf32>
    %115 = vector.shape_cast %112 : vector<2x4xf32> to vector<2x1x4xf32>
    tpu.vector_store %arg3[%c0_12, %c2, %c0_13], %115 {strides = array<i32>} : memref<2x8x4xf32, #tpu.memory_space<vmem>>, vector<2x1x4xf32>,
    %116 = vector.extract_strided_slice %24 {offsets = [0, 3, 0], sizes = [2, 1, 4], strides = [1, 1, 1]} : vector<2x8x4xf32> to vector<2x1x4xf32>
    %117 = vector.shape_cast %116 : vector<2x1x4xf32> to vector<2x4xf32>
    %118 = vector.extract_strided_slice %112 {offsets = [0, 0], sizes = [2, 1], strides = [1, 1]} : vector<2x4xf32> to vector<2x1xf32>
    %119 = vector.extract_strided_slice %2 {offsets = [0, 0], sizes = [1, 4], strides = [1, 1]} : vector<4x4xf32> to vector<1x4xf32>
    %120 = vector.broadcast %118 : vector<2x1xf32> to vector<2x4xf32>
    %121 = vector.broadcast %119 : vector<1x4xf32> to vector<2x4xf32>
    %122 = arith.mulf %120, %121 : vector<2x4xf32>
    %123 = arith.addf %117, %122 : vector<2x4xf32>
    %124 = vector.extract_strided_slice %112 {offsets = [0, 1], sizes = [2, 1], strides = [1, 1]} : vector<2x4xf32> to vector<2x1xf32>
    %125 = vector.extract_strided_slice %2 {offsets = [1, 0], sizes = [1, 4], strides = [1, 1]} : vector<4x4xf32> to vector<1x4xf32>
    %126 = vector.broadcast %124 : vector<2x1xf32> to vector<2x4xf32>
    %127 = vector.broadcast %125 : vector<1x4xf32> to vector<2x4xf32>
    %128 = arith.mulf %126, %127 : vector<2x4xf32>
    %129 = arith.addf %123, %128 : vector<2x4xf32>
    %130 = vector.extract_strided_slice %112 {offsets = [0, 2], sizes = [2, 1], strides = [1, 1]} : vector<2x4xf32> to vector<2x1xf32>
    %131 = vector.extract_strided_slice %2 {offsets = [2, 0], sizes = [1, 4], strides = [1, 1]} : vector<4x4xf32> to vector<1x4xf32>
    %132 = vector.broadcast %130 : vector<2x1xf32> to vector<2x4xf32>
    %133 = vector.broadcast %131 : vector<1x4xf32> to vector<2x4xf32>
    %134 = arith.mulf %132, %133 : vector<2x4xf32>
    %135 = arith.addf %129, %134 : vector<2x4xf32>
    %136 = vector.extract_strided_slice %112 {offsets = [0, 3], sizes = [2, 1], strides = [1, 1]} : vector<2x4xf32> to vector<2x1xf32>
    %137 = vector.extract_strided_slice %2 {offsets = [3, 0], sizes = [1, 4], strides = [1, 1]} : vector<4x4xf32> to vector<1x4xf32>
    %138 = vector.broadcast %136 : vector<2x1xf32> to vector<2x4xf32>
    %139 = vector.broadcast %137 : vector<1x4xf32> to vector<2x4xf32>
    %140 = arith.mulf %138, %139 : vector<2x4xf32>
    %141 = arith.addf %135, %140 : vector<2x4xf32>
    %142 = math.tanh %141 : vector<2x4xf32>
    %c0_14 = arith.constant 0 : index
    %c3 = arith.constant 3 : index
    %c0_15 = arith.constant 0 : index
    %143 = vector.load %arg3[%c0_14, %c3, %c0_15] : memref<2x8x4xf32, #tpu.memory_space<vmem>>, vector<2x1x4xf32>
    %144 = vector.shape_cast %143 : vector<2x1x4xf32> to vector<2x4xf32>
    %145 = vector.shape_cast %142 : vector<2x4xf32> to vector<2x1x4xf32>
    tpu.vector_store %arg3[%c0_14, %c3, %c0_15], %145 {strides = array<i32>} : memref<2x8x4xf32, #tpu.memory_space<vmem>>, vector<2x1x4xf32>,
    %146 = vector.extract_strided_slice %24 {offsets = [0, 4, 0], sizes = [2, 1, 4], strides = [1, 1, 1]} : vector<2x8x4xf32> to vector<2x1x4xf32>
    %147 = vector.shape_cast %146 : vector<2x1x4xf32> to vector<2x4xf32>
    %148 = vector.extract_strided_slice %142 {offsets = [0, 0], sizes = [2, 1], strides = [1, 1]} : vector<2x4xf32> to vector<2x1xf32>
    %149 = vector.extract_strided_slice %2 {offsets = [0, 0], sizes = [1, 4], strides = [1, 1]} : vector<4x4xf32> to vector<1x4xf32>
    %150 = vector.broadcast %148 : vector<2x1xf32> to vector<2x4xf32>
    %151 = vector.broadcast %149 : vector<1x4xf32> to vector<2x4xf32>
    %152 = arith.mulf %150, %151 : vector<2x4xf32>
    %153 = arith.addf %147, %152 : vector<2x4xf32>
    %154 = vector.extract_strided_slice %142 {offsets = [0, 1], sizes = [2, 1], strides = [1, 1]} : vector<2x4xf32> to vector<2x1xf32>
    %155 = vector.extract_strided_slice %2 {offsets = [1, 0], sizes = [1, 4], strides = [1, 1]} : vector<4x4xf32> to vector<1x4xf32>
    %156 = vector.broadcast %154 : vector<2x1xf32> to vector<2x4xf32>
    %157 = vector.broadcast %155 : vector<1x4xf32> to vector<2x4xf32>
    %158 = arith.mulf %156, %157 : vector<2x4xf32>
    %159 = arith.addf %153, %158 : vector<2x4xf32>
    %160 = vector.extract_strided_slice %142 {offsets = [0, 2], sizes = [2, 1], strides = [1, 1]} : vector<2x4xf32> to vector<2x1xf32>
    %161 = vector.extract_strided_slice %2 {offsets = [2, 0], sizes = [1, 4], strides = [1, 1]} : vector<4x4xf32> to vector<1x4xf32>
    %162 = vector.broadcast %160 : vector<2x1xf32> to vector<2x4xf32>
    %163 = vector.broadcast %161 : vector<1x4xf32> to vector<2x4xf32>
    %164 = arith.mulf %162, %163 : vector<2x4xf32>
    %165 = arith.addf %159, %164 : vector<2x4xf32>
    %166 = vector.extract_strided_slice %142 {offsets = [0, 3], sizes = [2, 1], strides = [1, 1]} : vector<2x4xf32> to vector<2x1xf32>
    %167 = vector.extract_strided_slice %2 {offsets = [3, 0], sizes = [1, 4], strides = [1, 1]} : vector<4x4xf32> to vector<1x4xf32>
    %168 = vector.broadcast %166 : vector<2x1xf32> to vector<2x4xf32>
    %169 = vector.broadcast %167 : vector<1x4xf32> to vector<2x4xf32>
    %170 = arith.mulf %168, %169 : vector<2x4xf32>
    %171 = arith.addf %165, %170 : vector<2x4xf32>
    %172 = math.tanh %171 : vector<2x4xf32>
    %c0_16 = arith.constant 0 : index
    %c4 = arith.constant 4 : index
    %c0_17 = arith.constant 0 : index
    %173 = vector.load %arg3[%c0_16, %c4, %c0_17] : memref<2x8x4xf32, #tpu.memory_space<vmem>>, vector<2x1x4xf32>
    %174 = vector.shape_cast %173 : vector<2x1x4xf32> to vector<2x4xf32>
    %175 = vector.shape_cast %172 : vector<2x4xf32> to vector<2x1x4xf32>
    tpu.vector_store %arg3[%c0_16, %c4, %c0_17], %175 {strides = array<i32>} : memref<2x8x4xf32, #tpu.memory_space<vmem>>, vector<2x1x4xf32>,
    %176 = vector.extract_strided_slice %24 {offsets = [0, 5, 0], sizes = [2, 1, 4], strides = [1, 1, 1]} : vector<2x8x4xf32> to vector<2x1x4xf32>
    %177 = vector.shape_cast %176 : vector<2x1x4xf32> to vector<2x4xf32>
    %178 = vector.extract_strided_slice %172 {offsets = [0, 0], sizes = [2, 1], strides = [1, 1]} : vector<2x4xf32> to vector<2x1xf32>
    %179 = vector.extract_strided_slice %2 {offsets = [0, 0], sizes = [1, 4], strides = [1, 1]} : vector<4x4xf32> to vector<1x4xf32>
    %180 = vector.broadcast %178 : vector<2x1xf32> to vector<2x4xf32>
    %181 = vector.broadcast %179 : vector<1x4xf32> to vector<2x4xf32>
    %182 = arith.mulf %180, %181 : vector<2x4xf32>
    %183 = arith.addf %177, %182 : vector<2x4xf32>
    %184 = vector.extract_strided_slice %172 {offsets = [0, 1], sizes = [2, 1], strides = [1, 1]} : vector<2x4xf32> to vector<2x1xf32>
    %185 = vector.extract_strided_slice %2 {offsets = [1, 0], sizes = [1, 4], strides = [1, 1]} : vector<4x4xf32> to vector<1x4xf32>
    %186 = vector.broadcast %184 : vector<2x1xf32> to vector<2x4xf32>
    %187 = vector.broadcast %185 : vector<1x4xf32> to vector<2x4xf32>
    %188 = arith.mulf %186, %187 : vector<2x4xf32>
    %189 = arith.addf %183, %188 : vector<2x4xf32>
    %190 = vector.extract_strided_slice %172 {offsets = [0, 2], sizes = [2, 1], strides = [1, 1]} : vector<2x4xf32> to vector<2x1xf32>
    %191 = vector.extract_strided_slice %2 {offsets = [2, 0], sizes = [1, 4], strides = [1, 1]} : vector<4x4xf32> to vector<1x4xf32>
    %192 = vector.broadcast %190 : vector<2x1xf32> to vector<2x4xf32>
    %193 = vector.broadcast %191 : vector<1x4xf32> to vector<2x4xf32>
    %194 = arith.mulf %192, %193 : vector<2x4xf32>
    %195 = arith.addf %189, %194 : vector<2x4xf32>
    %196 = vector.extract_strided_slice %172 {offsets = [0, 3], sizes = [2, 1], strides = [1, 1]} : vector<2x4xf32> to vector<2x1xf32>
    %197 = vector.extract_strided_slice %2 {offsets = [3, 0], sizes = [1, 4], strides = [1, 1]} : vector<4x4xf32> to vector<1x4xf32>
    %198 = vector.broadcast %196 : vector<2x1xf32> to vector<2x4xf32>
    %199 = vector.broadcast %197 : vector<1x4xf32> to vector<2x4xf32>
    %200 = arith.mulf %198, %199 : vector<2x4xf32>
    %201 = arith.addf %195, %200 : vector<2x4xf32>
    %202 = math.tanh %201 : vector<2x4xf32>
    %c0_18 = arith.constant 0 : index
    %c5 = arith.constant 5 : index
    %c0_19 = arith.constant 0 : index
    %203 = vector.load %arg3[%c0_18, %c5, %c0_19] : memref<2x8x4xf32, #tpu.memory_space<vmem>>, vector<2x1x4xf32>
    %204 = vector.shape_cast %203 : vector<2x1x4xf32> to vector<2x4xf32>
    %205 = vector.shape_cast %202 : vector<2x4xf32> to vector<2x1x4xf32>
    tpu.vector_store %arg3[%c0_18, %c5, %c0_19], %205 {strides = array<i32>} : memref<2x8x4xf32, #tpu.memory_space<vmem>>, vector<2x1x4xf32>,
    %206 = vector.extract_strided_slice %24 {offsets = [0, 6, 0], sizes = [2, 1, 4], strides = [1, 1, 1]} : vector<2x8x4xf32> to vector<2x1x4xf32>
    %207 = vector.shape_cast %206 : vector<2x1x4xf32> to vector<2x4xf32>
    %208 = vector.extract_strided_slice %202 {offsets = [0, 0], sizes = [2, 1], strides = [1, 1]} : vector<2x4xf32> to vector<2x1xf32>
    %209 = vector.extract_strided_slice %2 {offsets = [0, 0], sizes = [1, 4], strides = [1, 1]} : vector<4x4xf32> to vector<1x4xf32>
    %210 = vector.broadcast %208 : vector<2x1xf32> to vector<2x4xf32>
    %211 = vector.broadcast %209 : vector<1x4xf32> to vector<2x4xf32>
    %212 = arith.mulf %210, %211 : vector<2x4xf32>
    %213 = arith.addf %207, %212 : vector<2x4xf32>
    %214 = vector.extract_strided_slice %202 {offsets = [0, 1], sizes = [2, 1], strides = [1, 1]} : vector<2x4xf32> to vector<2x1xf32>
    %215 = vector.extract_strided_slice %2 {offsets = [1, 0], sizes = [1, 4], strides = [1, 1]} : vector<4x4xf32> to vector<1x4xf32>
    %216 = vector.broadcast %214 : vector<2x1xf32> to vector<2x4xf32>
    %217 = vector.broadcast %215 : vector<1x4xf32> to vector<2x4xf32>
    %218 = arith.mulf %216, %217 : vector<2x4xf32>
    %219 = arith.addf %213, %218 : vector<2x4xf32>
    %220 = vector.extract_strided_slice %202 {offsets = [0, 2], sizes = [2, 1], strides = [1, 1]} : vector<2x4xf32> to vector<2x1xf32>
    %221 = vector.extract_strided_slice %2 {offsets = [2, 0], sizes = [1, 4], strides = [1, 1]} : vector<4x4xf32> to vector<1x4xf32>
    %222 = vector.broadcast %220 : vector<2x1xf32> to vector<2x4xf32>
    %223 = vector.broadcast %221 : vector<1x4xf32> to vector<2x4xf32>
    %224 = arith.mulf %222, %223 : vector<2x4xf32>
    %225 = arith.addf %219, %224 : vector<2x4xf32>
    %226 = vector.extract_strided_slice %202 {offsets = [0, 3], sizes = [2, 1], strides = [1, 1]} : vector<2x4xf32> to vector<2x1xf32>
    %227 = vector.extract_strided_slice %2 {offsets = [3, 0], sizes = [1, 4], strides = [1, 1]} : vector<4x4xf32> to vector<1x4xf32>
    %228 = vector.broadcast %226 : vector<2x1xf32> to vector<2x4xf32>
    %229 = vector.broadcast %227 : vector<1x4xf32> to vector<2x4xf32>
    %230 = arith.mulf %228, %229 : vector<2x4xf32>
    %231 = arith.addf %225, %230 : vector<2x4xf32>
    %232 = math.tanh %231 : vector<2x4xf32>
    %c0_20 = arith.constant 0 : index
    %c6 = arith.constant 6 : index
    %c0_21 = arith.constant 0 : index
    %233 = vector.load %arg3[%c0_20, %c6, %c0_21] : memref<2x8x4xf32, #tpu.memory_space<vmem>>, vector<2x1x4xf32>
    %234 = vector.shape_cast %233 : vector<2x1x4xf32> to vector<2x4xf32>
    %235 = vector.shape_cast %232 : vector<2x4xf32> to vector<2x1x4xf32>
    tpu.vector_store %arg3[%c0_20, %c6, %c0_21], %235 {strides = array<i32>} : memref<2x8x4xf32, #tpu.memory_space<vmem>>, vector<2x1x4xf32>,
    %236 = vector.extract_strided_slice %24 {offsets = [0, 7, 0], sizes = [2, 1, 4], strides = [1, 1, 1]} : vector<2x8x4xf32> to vector<2x1x4xf32>
    %237 = vector.shape_cast %236 : vector<2x1x4xf32> to vector<2x4xf32>
    %238 = vector.extract_strided_slice %232 {offsets = [0, 0], sizes = [2, 1], strides = [1, 1]} : vector<2x4xf32> to vector<2x1xf32>
    %239 = vector.extract_strided_slice %2 {offsets = [0, 0], sizes = [1, 4], strides = [1, 1]} : vector<4x4xf32> to vector<1x4xf32>
    %240 = vector.broadcast %238 : vector<2x1xf32> to vector<2x4xf32>
    %241 = vector.broadcast %239 : vector<1x4xf32> to vector<2x4xf32>
    %242 = arith.mulf %240, %241 : vector<2x4xf32>
    %243 = arith.addf %237, %242 : vector<2x4xf32>
    %244 = vector.extract_strided_slice %232 {offsets = [0, 1], sizes = [2, 1], strides = [1, 1]} : vector<2x4xf32> to vector<2x1xf32>
    %245 = vector.extract_strided_slice %2 {offsets = [1, 0], sizes = [1, 4], strides = [1, 1]} : vector<4x4xf32> to vector<1x4xf32>
    %246 = vector.broadcast %244 : vector<2x1xf32> to vector<2x4xf32>
    %247 = vector.broadcast %245 : vector<1x4xf32> to vector<2x4xf32>
    %248 = arith.mulf %246, %247 : vector<2x4xf32>
    %249 = arith.addf %243, %248 : vector<2x4xf32>
    %250 = vector.extract_strided_slice %232 {offsets = [0, 2], sizes = [2, 1], strides = [1, 1]} : vector<2x4xf32> to vector<2x1xf32>
    %251 = vector.extract_strided_slice %2 {offsets = [2, 0], sizes = [1, 4], strides = [1, 1]} : vector<4x4xf32> to vector<1x4xf32>
    %252 = vector.broadcast %250 : vector<2x1xf32> to vector<2x4xf32>
    %253 = vector.broadcast %251 : vector<1x4xf32> to vector<2x4xf32>
    %254 = arith.mulf %252, %253 : vector<2x4xf32>
    %255 = arith.addf %249, %254 : vector<2x4xf32>
    %256 = vector.extract_strided_slice %232 {offsets = [0, 3], sizes = [2, 1], strides = [1, 1]} : vector<2x4xf32> to vector<2x1xf32>
    %257 = vector.extract_strided_slice %2 {offsets = [3, 0], sizes = [1, 4], strides = [1, 1]} : vector<4x4xf32> to vector<1x4xf32>
    %258 = vector.broadcast %256 : vector<2x1xf32> to vector<2x4xf32>
    %259 = vector.broadcast %257 : vector<1x4xf32> to vector<2x4xf32>
    %260 = arith.mulf %258, %259 : vector<2x4xf32>
    %261 = arith.addf %255, %260 : vector<2x4xf32>
    %262 = math.tanh %261 : vector<2x4xf32>
    %c0_22 = arith.constant 0 : index
    %c7 = arith.constant 7 : index
    %c0_23 = arith.constant 0 : index
    %263 = vector.load %arg3[%c0_22, %c7, %c0_23] : memref<2x8x4xf32, #tpu.memory_space<vmem>>, vector<2x1x4xf32>
    %264 = vector.shape_cast %263 : vector<2x1x4xf32> to vector<2x4xf32>
    %265 = vector.shape_cast %262 : vector<2x4xf32> to vector<2x1x4xf32>
    tpu.vector_store %arg3[%c0_22, %c7, %c0_23], %265 {strides = array<i32>} : memref<2x8x4xf32, #tpu.memory_space<vmem>>, vector<2x1x4xf32>,
    %c0_24 = arith.constant 0 : index
    %c0_25 = arith.constant 0 : index
    %c0_26 = arith.constant 0 : index
    %266 = vector.load %arg4[%c0_24, %c0_25, %c0_26] : memref<1x2x4xf32, #tpu.memory_space<vmem>>, vector<1x2x4xf32>
    %267 = vector.shape_cast %266 : vector<1x2x4xf32> to vector<2x4xf32>
    %268 = vector.shape_cast %262 : vector<2x4xf32> to vector<1x2x4xf32>
    tpu.vector_store %arg4[%c0_24, %c0_25, %c0_26], %268 {strides = array<i32>} : memref<1x2x4xf32, #tpu.memory_space<vmem>>, vector<1x2x4xf32>,
    return
  }
}

</mosaic_0001>

<bundles_post_ra>
// kernel: rnn_forward.1
= control target key start
LH: loop header
LB: loop body
LE: loop exit
PB: predicated region body
PF: predicated region fallthrough
CT: control target
= control target key end

     0   :  { %v796_v2 = vmov 0   ;;  %s1042_s0 = inlined_call_operand.vmem [shape: f32[2,8,3], index: 0, kind: input, shape index: {}]   ;;  %s1043_s1 = inlined_call_operand.vmem [shape: f32[3,4], index: 1, kind: input, shape index: {}]   ;;  %s1044_s2 = inlined_call_operand.vmem [shape: f32[4,4], index: 2, kind: input, shape index: {}]   ;;  %s1045_s3 = inlined_call_operand.vmem [shape: f32[2,8,4], index: 3, kind: output, shape index: {0}]   ;;  %s1046_s4 = inlined_call_operand.hbm [shape: f32[1,2,4], index: 4, kind: output, shape index: {1}]  }
   0x1   :  { %v18_v0 = vld [vmem:[%s1042_s0 + $0x8] sm:$0xff]  ;;  %v17_v1 = vld [vmem:[%s1042_s0] sm:$0xff]  ;;  %689 = vset.pattern.permute.xlu1 %v796_v2  ;;  %687 = vset.pattern.permute.xlu0 %v796_v2 }
   0x2   :  { %10 = vsyncpa [#allocation3], 0  ;;  %28 = vperm.xlu0 %687, %v18_v0   ;;  %23 = vperm.xlu1 %689, %v17_v1   ;;  %v797_v3 = vmov 1   ;;  %v798_v4 = vmov 2   ;;  %v31_v5 = vlaneseq  ;;  %v19_v11 = vld [vmem:[%s1043_s1] sm:$0x7] }
   0x3   :  { %v20_v12 = vld [vmem:[%s1044_s2] sm:$0xf]  ;;  %vm101_vm0 = vcmask 24576   ;;  %v799_v50 = vmov 3   ;;  %vm180_vm1 = vcmask 25601   ;;  %vm259_vm2 = vcmask 26626  }
   0x4   :  { %v32_v6 = vshrl.u32 %v31_v5, 7  ;;  %vm338_vm3 = vcmask 27651   ;;  %vm417_vm4 = vcmask 28676   ;;  %vm496_vm5 = vcmask 29701   ;;  %s800_s21 = smov [#allocation2]  }
   0x5   :  { %vm575_vm6 = vcmask 30726   ;;  %vm654_vm7 = vcmask 31751   ;;  %s672_s1 = sshll.u32 %s800_s21, 4  ;;  %s673_s1 = int_to_ptr.vmem [resolvable:$true] %s672_s1 }
   0x6   :  { %688 = vset.pattern.permute.xlu0 %v797_v3  ;;  %690 = vset.pattern.permute.xlu1 %v797_v3  ;;  %v49_v7 = vsub.s32 1, %v32_v6  ;;  %v33_v10 = vsub.s32 0, %v32_v6  ;;  %v65_v14 = vsub.s32 2, %v32_v6  ;;  %v94_v22 = vsub.s32 3, %v32_v6  ;;  %s772_s25 = scalar_lea.vmem %s673_s1, 32  ;;  %p777_p1 = scmp.lt.s32.totalorder %s673_s1, %s673_s1 }
   0x7   :  { %44 = vperm.xlu0 %688, %v18_v0   ;;  %40 = vperm.xlu1 %690, %v17_v1   ;;  %p773_p0 = scmp.ne.s32.totalorder %s673_s1, %s772_s25  ;;  %p778_p2 = scmp.lt.s32.totalorder %s772_s25, %s772_s25 }
   0x8   :  { %v50_v13 = vrot.slane %v19_v11, %v49_v7  ;;  %v34_v15 = vrot.slane %v19_v11, %v33_v10  ;;  %v846_v18 = vrot.slane %v20_v12, %v33_v10  ;;  %v66_v21 = vrot.slane %v19_v11, %v65_v14 }
   0x9   :  { %v848_v25 = vrot.slane %v20_v12, %v49_v7  ;;  %v851_v27 = vrot.slane %v20_v12, %v65_v14  ;;  %v853_v34 = vrot.slane %v20_v12, %v94_v22  ;;  %p779_p3 = por %p778_p2, %p777_p1 }
   0xa   :  { %v75_v26 = vmul.f32 0.0, %v846_v18 }
   0xb   :  { %692 = vset.pattern.permute.xlu0 %v798_v4  ;;  %691 = vset.pattern.permute.xlu1 %v798_v4  ;;  %v82_v35 = vmul.f32 0.0, %v848_v25  ;;  %v89_v38 = vmul.f32 0.0, %v851_v27  ;;  %v96_v41 = vmul.f32 0.0, %v853_v34  ;;  %p780_p4 = pnand %p779_p3, %p773_p0 }
   0xc   :  { %56 = vperm.xlu0 %692, %v17_v1   ;;  %60 = vperm.xlu1 %691, %v18_v0  }
  0x10   :  { %694 = vset.pattern.permute.xlu0 %v797_v3  ;;  %693 = vset.pattern.permute.xlu1 %v796_v2 }
  0x81   :  { %v24_v8 = vpop.permute.xlu1 %23  ;;  %v29_v9 = vpop.permute.xlu0 %28 }
  0x82   :  { %v35_v23 = vmul.f32 %v34_v15, %v24_v8  ;;  %v36_v24 = vmul.f32 %v34_v15, %v29_v9 }
  0x86   :  { %v45_v16 = vpop.permute.xlu0 %44  ;;  %v41_v17 = vpop.permute.xlu1 %40 }
  0x87   :  { %v52_v19 = vmul.f32 %v50_v13, %v45_v16  ;;  %v51_v20 = vmul.f32 %v50_v13, %v41_v17 }
  0x89   :  { %v54_v30 = vadd.f32 %v52_v19, %v36_v24  ;;  %v53_v31 = vadd.f32 %v51_v20, %v35_v23 }
  0x8b   :  { %v57_v28 = vpop.permute.xlu0 %56  ;;  %v61_v29 = vpop.permute.xlu1 %60 }
  0x8c   :  { %v67_v32 = vmul.f32 %v66_v21, %v57_v28  ;;  %v68_v33 = vmul.f32 %v66_v21, %v61_v29 }
  0x8e   :  { %v856_v36 = vadd.f32 %v67_v32, %v53_v31  ;;  %v858_v37 = vadd.f32 %v68_v33, %v54_v30 }
  0x90   :  { %v76_v39 = vadd.f32 %v75_v26, %v856_v36  ;;  %v77_v40 = vadd.f32 %v75_v26, %v858_v37 }
  0x92   :  { %v83_v42 = vadd.f32 %v82_v35, %v76_v39  ;;  %v84_v43 = vadd.f32 %v82_v35, %v77_v40 }
  0x94   :  { %v90_v44 = vadd.f32 %v89_v38, %v83_v42  ;;  %v91_v45 = vadd.f32 %v89_v38, %v84_v43 }
  0x96   :  { %v97_v46 = vadd.f32 %v96_v41, %v90_v44  ;;  %v98_v47 = vadd.f32 %v96_v41, %v91_v45 }
  0x98   :  { %740 = vtanh.f32 %v97_v46 }
  0x99   :  { %742 = vtanh.f32 %v98_v47 }
  0xa2   :  { %v741_v48 = vpop.eup %740 }
  0xa3   :  { %v743_v49 = vpop.eup %742  ;;  %102 = vst.msk [vmem:[%s1045_s3] sm:$0x1] %vm101_vm0, %v741_v48 }
  0xa4   :  { %129 = vperm.xlu0 %694, %v743_v49   ;;  %111 = vperm.xlu1 %693, %v743_v49   ;;  %103 = vst.msk [vmem:[%s1045_s3 + $0x8] sm:$0x1] %vm101_vm0, %v743_v49 }
  0xa8   :  { %697 = vset.pattern.permute.xlu0 %v798_v4  ;;  %106 = vperm.xlu1 %693, %v741_v48  }
  0xa9   :  { %143 = vperm.xlu0 %697, %v741_v48  }
  0xac   :  { %695 = vset.pattern.permute.xlu1 %v797_v3 }
  0xad   :  { %125 = vperm.xlu1 %695, %v741_v48   ;;  %699 = vset.pattern.permute.xlu0 %v796_v2 }
  0xb1   :  { %696 = vset.pattern.permute.xlu1 %v798_v4 }
  0xb2   :  { %147 = vperm.xlu1 %696, %v743_v49  }
  0xb6   :  { %698 = vset.pattern.permute.xlu1 %v799_v50 }
  0xb7   :  { %165 = vperm.xlu1 %698, %v743_v49  }
  0xbb   :  { %161 = vperm.xlu1 %698, %v741_v48  }
  0xbf   :  { %700 = vset.pattern.permute.xlu1 %v796_v2 }
 0x123   :  { %v112_v51 = vpop.permute.xlu1 %111  ;;  %v130_v55 = vpop.permute.xlu0 %129 }
 0x124   :  { %v115_v53 = vmul.f32 %v112_v51, %v846_v18  ;;  %v133_v58 = vmul.f32 %v130_v55, %v848_v25 }
 0x126   :  { %v119_v56 = vrot.slane %v115_v53, 7  ;;  %v137_v1 = vrot.slane %v133_v58, 7 }
 0x127   :  { %v107_v52 = vpop.permute.xlu1 %106 }
 0x128   :  { %v114_v57 = vmul.f32 %v107_v52, %v846_v18  ;;  %v123_v62 = vadd.f32 %v119_v56, %v858_v37  ;;  %v144_v0 = vpop.permute.xlu0 %143 }
 0x129   :  { %v150_v9 = vmul.f32 %v144_v0, %v851_v27 }
 0x12a   :  { %v118_v63 = vrot.slane %v114_v57, 7  ;;  %v141_v10 = vadd.f32 %v137_v1, %v123_v62 }
 0x12b   :  { %v154_v16 = vrot.slane %v150_v9, 7 }
 0x12c   :  { %v126_v54 = vpop.permute.xlu1 %125  ;;  %v122_v8 = vadd.f32 %v118_v63, %v856_v36 }
 0x12d   :  { %v132_v59 = vmul.f32 %v126_v54, %v848_v25 }
 0x12f   :  { %v136_v5 = vrot.slane %v132_v59, 7 }
 0x131   :  { %v148_v60 = vpop.permute.xlu1 %147  ;;  %v140_v12 = vadd.f32 %v136_v5, %v122_v8 }
 0x132   :  { %v151_v61 = vmul.f32 %v148_v60, %v851_v27 }
 0x133   :  { %v158_v20 = vadd.f32 %v154_v16, %v140_v12 }
 0x134   :  { %v155_v6 = vrot.slane %v151_v61, 7 }
 0x136   :  { %v166_v7 = vpop.permute.xlu1 %165  ;;  %v159_v13 = vadd.f32 %v155_v6, %v141_v10 }
 0x137   :  { %v169_v11 = vmul.f32 %v166_v7, %v853_v34 }
 0x139   :  { %v173_v14 = vrot.slane %v169_v11, 7 }
 0x13a   :  { %v162_v15 = vpop.permute.xlu1 %161 }
 0x13b   :  { %v177_v17 = vadd.f32 %v173_v14, %v159_v13  ;;  %v168_v19 = vmul.f32 %v162_v15, %v853_v34 }
 0x13d   :  { %744 = vtanh.f32 %v177_v17  ;;  %v172_v21 = vrot.slane %v168_v19, 7 }
 0x13f   :  { %v176_v22 = vadd.f32 %v172_v21, %v158_v20 }
 0x141   :  { %746 = vtanh.f32 %v176_v22 }
 0x147   :  { %v745_v23 = vpop.eup %744 }
 0x148   :  { %182 = vst.msk [vmem:[%s1045_s3 + $0x8] sm:$0x2] %vm180_vm1, %v745_v23  ;;  %190 = vperm.xlu0 %699, %v745_v23  }
 0x14b   :  { %v747_v24 = vpop.eup %746 }
 0x14c   :  { %181 = vst.msk [vmem:[%s1045_s3] sm:$0x2] %vm180_vm1, %v747_v24  ;;  %702 = vset.pattern.permute.xlu0 %v797_v3  ;;  %185 = vperm.xlu1 %700, %v747_v24  }
 0x14d   :  { %204 = vperm.xlu0 %702, %v747_v24  }
 0x150   :  { %701 = vset.pattern.permute.xlu1 %v797_v3 }
 0x151   :  { %704 = vset.pattern.permute.xlu0 %v799_v50  ;;  %208 = vperm.xlu1 %701, %v745_v23  }
 0x152   :  { %244 = vperm.xlu0 %704, %v745_v23  }
 0x155   :  { %703 = vset.pattern.permute.xlu1 %v798_v4 }
 0x156   :  { %226 = vperm.xlu1 %703, %v745_v23   ;;  %707 = vset.pattern.permute.xlu0 %v796_v2 }
 0x15a   :  { %222 = vperm.xlu1 %703, %v747_v24  }
 0x15e   :  { %705 = vset.pattern.permute.xlu1 %v799_v50 }
 0x15f   :  { %240 = vperm.xlu1 %705, %v747_v24  }
 0x163   :  { %706 = vset.pattern.permute.xlu1 %v796_v2 }
 0x1c7   :  { %v191_v26 = vpop.permute.xlu0 %190 }
 0x1c8   :  { %v194_v30 = vmul.f32 %v191_v26, %v846_v18 }
 0x1ca   :  { %v198_v33 = vrot.slane %v194_v30, 7 }
 0x1cb   :  { %v186_v28 = vpop.permute.xlu1 %185 }
 0x1cc   :  { %v205_v29 = vpop.permute.xlu0 %204  ;;  %v193_v35 = vmul.f32 %v186_v28, %v846_v18  ;;  %v202_v41 = vadd.f32 %v198_v33, %v858_v37 }
 0x1cd   :  { %v211_v45 = vmul.f32 %v205_v29, %v848_v25 }
 0x1ce   :  { %v197_v44 = vrot.slane %v193_v35, 7 }
 0x1cf   :  { %v215_v54 = vrot.slane %v211_v45, 7 }
 0x1d0   :  { %v209_v31 = vpop.permute.xlu1 %208  ;;  %v201_v53 = vadd.f32 %v197_v44, %v856_v36 }
 0x1d1   :  { %v212_v32 = vmul.f32 %v209_v31, %v848_v25  ;;  %v245_v38 = vpop.permute.xlu0 %244 }
 0x1d2   :  { %v248_v42 = vmul.f32 %v245_v38, %v853_v34  ;;  %v219_v58 = vadd.f32 %v215_v54, %v201_v53 }
 0x1d3   :  { %v216_v39 = vrot.slane %v212_v32, 7 }
 0x1d4   :  { %v252_v49 = vrot.slane %v248_v42, 7 }
 0x1d5   :  { %v227_v40 = vpop.permute.xlu1 %226  ;;  %v220_v46 = vadd.f32 %v216_v39, %v202_v41 }
 0x1d6   :  { %v230_v43 = vmul.f32 %v227_v40, %v851_v27 }
 0x1d8   :  { %v234_v47 = vrot.slane %v230_v43, 7 }
 0x1d9   :  { %v223_v48 = vpop.permute.xlu1 %222 }
 0x1da   :  { %v238_v51 = vadd.f32 %v234_v47, %v220_v46  ;;  %v229_v52 = vmul.f32 %v223_v48, %v851_v27 }
 0x1dc   :  { %v256_v55 = vadd.f32 %v252_v49, %v238_v51  ;;  %v233_v56 = vrot.slane %v229_v52, 7 }
 0x1de   :  { %748 = vtanh.f32 %v256_v55  ;;  %v241_v57 = vpop.permute.xlu1 %240  ;;  %v237_v60 = vadd.f32 %v233_v56, %v219_v58 }
 0x1df   :  { %v247_v59 = vmul.f32 %v241_v57, %v853_v34 }
 0x1e1   :  { %v251_v61 = vrot.slane %v247_v59, 7 }
 0x1e3   :  { %v255_v62 = vadd.f32 %v251_v61, %v237_v60 }
 0x1e5   :  { %750 = vtanh.f32 %v255_v62 }
 0x1e8   :  { %v749_v63 = vpop.eup %748 }
 0x1e9   :  { %261 = vst.msk [vmem:[%s1045_s3 + $0x8] sm:$0x4] %vm259_vm2, %v749_v63  ;;  %269 = vperm.xlu1 %706, %v749_v63  }
 0x1ed   :  { %708 = vset.pattern.permute.xlu1 %v797_v3 }
 0x1ee   :  { %287 = vperm.xlu1 %708, %v749_v63  }
 0x1ef   :  { %v751_v0 = vpop.eup %750 }
 0x1f0   :  { %260 = vst.msk [vmem:[%s1045_s3] sm:$0x4] %vm259_vm2, %v751_v0  ;;  %264 = vperm.xlu0 %707, %v751_v0  }
 0x1f2   :  { %283 = vperm.xlu1 %708, %v751_v0  }
 0x1f4   :  { %709 = vset.pattern.permute.xlu0 %v798_v4 }
 0x1f5   :  { %305 = vperm.xlu0 %709, %v749_v63  }
 0x1f6   :  { %710 = vset.pattern.permute.xlu1 %v798_v4 }
 0x1f7   :  { %301 = vperm.xlu1 %710, %v751_v0  }
 0x1f9   :  { %712 = vset.pattern.permute.xlu0 %v799_v50 }
 0x1fa   :  { %319 = vperm.xlu0 %712, %v751_v0  }
 0x1fb   :  { %711 = vset.pattern.permute.xlu1 %v799_v50 }
 0x1fc   :  { %323 = vperm.xlu1 %711, %v749_v63  }
 0x1fe   :  { %714 = vset.pattern.permute.xlu0 %v797_v3 }
 0x200   :  { %713 = vset.pattern.permute.xlu1 %v796_v2 }
 0x268   :  { %v270_v1 = vpop.permute.xlu1 %269 }
 0x269   :  { %v273_v9 = vmul.f32 %v270_v1, %v846_v18 }
 0x26b   :  { %v277_v16 = vrot.slane %v273_v9, 7 }
 0x26d   :  { %v288_v5 = vpop.permute.xlu1 %287  ;;  %v281_v26 = vadd.f32 %v277_v16, %v858_v37 }
 0x26e   :  { %v291_v12 = vmul.f32 %v288_v5, %v848_v25 }
 0x26f   :  { %v265_v6 = vpop.permute.xlu0 %264 }
 0x270   :  { %v272_v7 = vmul.f32 %v265_v6, %v846_v18  ;;  %v295_v21 = vrot.slane %v291_v12, 7 }
 0x271   :  { %v284_v8 = vpop.permute.xlu1 %283 }
 0x272   :  { %v276_v10 = vrot.slane %v272_v7, 7  ;;  %v290_v11 = vmul.f32 %v284_v8, %v848_v25  ;;  %v299_v32 = vadd.f32 %v295_v21, %v281_v26 }
 0x274   :  { %v306_v13 = vpop.permute.xlu0 %305  ;;  %v280_v14 = vadd.f32 %v276_v10, %v856_v36  ;;  %v294_v15 = vrot.slane %v290_v11, 7 }
 0x275   :  { %v309_v17 = vmul.f32 %v306_v13, %v851_v27 }
 0x276   :  { %v302_v19 = vpop.permute.xlu1 %301  ;;  %v298_v22 = vadd.f32 %v294_v15, %v280_v14 }
 0x277   :  { %v308_v20 = vmul.f32 %v302_v19, %v851_v27  ;;  %v313_v28 = vrot.slane %v309_v17, 7 }
 0x279   :  { %v312_v23 = vrot.slane %v308_v20, 7  ;;  %v320_v24 = vpop.permute.xlu0 %319  ;;  %v317_v38 = vadd.f32 %v313_v28, %v299_v32 }
 0x27a   :  { %v326_v29 = vmul.f32 %v320_v24, %v853_v34 }
 0x27b   :  { %v316_v30 = vadd.f32 %v312_v23, %v298_v22  ;;  %v324_v31 = vpop.permute.xlu1 %323 }
 0x27c   :  { %v330_v33 = vrot.slane %v326_v29, 7  ;;  %v327_v35 = vmul.f32 %v324_v31, %v853_v34 }
 0x27e   :  { %v334_v39 = vadd.f32 %v330_v33, %v316_v30  ;;  %v331_v40 = vrot.slane %v327_v35, 7 }
 0x280   :  { %752 = vtanh.f32 %v334_v39  ;;  %v335_v41 = vadd.f32 %v331_v40, %v317_v38 }
 0x282   :  { %754 = vtanh.f32 %v335_v41 }
 0x28a   :  { %v753_v42 = vpop.eup %752 }
 0x28b   :  { %339 = vst.msk [vmem:[%s1045_s3] sm:$0x8] %vm338_vm3, %v753_v42 }
 0x28c   :  { %v755_v43 = vpop.eup %754 }
 0x28d   :  { %340 = vst.msk [vmem:[%s1045_s3 + $0x8] sm:$0x8] %vm338_vm3, %v755_v43  ;;  %366 = vperm.xlu0 %714, %v755_v43   ;;  %348 = vperm.xlu1 %713, %v755_v43  }
 0x291   :  { %717 = vset.pattern.permute.xlu0 %v798_v4  ;;  %343 = vperm.xlu1 %713, %v753_v42  }
 0x292   :  { %380 = vperm.xlu0 %717, %v753_v42  }
 0x295   :  { %715 = vset.pattern.permute.xlu1 %v797_v3 }
 0x296   :  { %362 = vperm.xlu1 %715, %v753_v42   ;;  %719 = vset.pattern.permute.xlu0 %v796_v2 }
 0x29a   :  { %716 = vset.pattern.permute.xlu1 %v798_v4 }
 0x29b   :  { %384 = vperm.xlu1 %716, %v755_v43  }
 0x29f   :  { %718 = vset.pattern.permute.xlu1 %v799_v50 }
 0x2a0   :  { %402 = vperm.xlu1 %718, %v755_v43  }
 0x2a4   :  { %398 = vperm.xlu1 %718, %v753_v42  }
 0x2a8   :  { %720 = vset.pattern.permute.xlu1 %v796_v2 }
 0x30c   :  { %v349_v44 = vpop.permute.xlu1 %348  ;;  %v367_v48 = vpop.permute.xlu0 %366 }
 0x30d   :  { %v352_v46 = vmul.f32 %v349_v44, %v846_v18  ;;  %v370_v52 = vmul.f32 %v367_v48, %v848_v25 }
 0x30f   :  { %v356_v49 = vrot.slane %v352_v46, 7  ;;  %v374_v59 = vrot.slane %v370_v52, 7 }
 0x310   :  { %v344_v45 = vpop.permute.xlu1 %343 }
 0x311   :  { %v351_v51 = vmul.f32 %v344_v45, %v846_v18  ;;  %v360_v56 = vadd.f32 %v356_v49, %v858_v37  ;;  %v381_v58 = vpop.permute.xlu0 %380 }
 0x312   :  { %v387_v0 = vmul.f32 %v381_v58, %v851_v27 }
 0x313   :  { %v355_v57 = vrot.slane %v351_v51, 7  ;;  %v378_v1 = vadd.f32 %v374_v59, %v360_v56 }
 0x314   :  { %v391_v10 = vrot.slane %v387_v0, 7 }
 0x315   :  { %v363_v47 = vpop.permute.xlu1 %362  ;;  %v359_v63 = vadd.f32 %v355_v57, %v856_v36 }
 0x316   :  { %v369_v53 = vmul.f32 %v363_v47, %v848_v25 }
 0x318   :  { %v373_v60 = vrot.slane %v369_v53, 7 }
 0x31a   :  { %v385_v54 = vpop.permute.xlu1 %384  ;;  %v377_v6 = vadd.f32 %v373_v60, %v359_v63 }
 0x31b   :  { %v388_v55 = vmul.f32 %v385_v54, %v851_v27 }
 0x31c   :  { %v395_v13 = vadd.f32 %v391_v10, %v377_v6 }
 0x31d   :  { %v392_v61 = vrot.slane %v388_v55, 7 }
 0x31f   :  { %v403_v62 = vpop.permute.xlu1 %402  ;;  %v396_v7 = vadd.f32 %v392_v61, %v378_v1 }
 0x320   :  { %v406_v5 = vmul.f32 %v403_v62, %v853_v34 }
 0x322   :  { %v410_v8 = vrot.slane %v406_v5, 7 }
 0x323   :  { %v399_v9 = vpop.permute.xlu1 %398 }
 0x324   :  { %v414_v11 = vadd.f32 %v410_v8, %v396_v7  ;;  %v405_v12 = vmul.f32 %v399_v9, %v853_v34 }
 0x326   :  { %756 = vtanh.f32 %v414_v11  ;;  %v409_v14 = vrot.slane %v405_v12, 7 }
 0x328   :  { %v413_v15 = vadd.f32 %v409_v14, %v395_v13 }
 0x32a   :  { %758 = vtanh.f32 %v413_v15 }
 0x330   :  { %v757_v16 = vpop.eup %756 }
 0x331   :  { %419 = vst.msk [vmem:[%s1045_s3 + $0x8] sm:$0x10] %vm417_vm4, %v757_v16  ;;  %427 = vperm.xlu0 %719, %v757_v16  }
 0x334   :  { %v759_v17 = vpop.eup %758 }
 0x335   :  { %418 = vst.msk [vmem:[%s1045_s3] sm:$0x10] %vm417_vm4, %v759_v17  ;;  %722 = vset.pattern.permute.xlu0 %v797_v3  ;;  %422 = vperm.xlu1 %720, %v759_v17  }
 0x336   :  { %441 = vperm.xlu0 %722, %v759_v17  }
 0x339   :  { %721 = vset.pattern.permute.xlu1 %v797_v3 }
 0x33a   :  { %724 = vset.pattern.permute.xlu0 %v799_v50  ;;  %445 = vperm.xlu1 %721, %v757_v16  }
 0x33b   :  { %481 = vperm.xlu0 %724, %v757_v16  }
 0x33e   :  { %723 = vset.pattern.permute.xlu1 %v798_v4 }
 0x33f   :  { %463 = vperm.xlu1 %723, %v757_v16   ;;  %727 = vset.pattern.permute.xlu0 %v796_v2 }
 0x343   :  { %459 = vperm.xlu1 %723, %v759_v17  }
 0x347   :  { %725 = vset.pattern.permute.xlu1 %v799_v50 }
 0x348   :  { %477 = vperm.xlu1 %725, %v759_v17  }
 0x34c   :  { %726 = vset.pattern.permute.xlu1 %v796_v2 }
 0x3b0   :  { %v428_v19 = vpop.permute.xlu0 %427 }
 0x3b1   :  { %v431_v22 = vmul.f32 %v428_v19, %v846_v18 }
 0x3b3   :  { %v435_v26 = vrot.slane %v431_v22, 7 }
 0x3b4   :  { %v423_v20 = vpop.permute.xlu1 %422 }
 0x3b5   :  { %v442_v21 = vpop.permute.xlu0 %441  ;;  %v430_v28 = vmul.f32 %v423_v20, %v846_v18  ;;  %v439_v32 = vadd.f32 %v435_v26, %v858_v37 }
 0x3b6   :  { %v448_v39 = vmul.f32 %v442_v21, %v848_v25 }
 0x3b7   :  { %v434_v38 = vrot.slane %v430_v28, 7 }
 0x3b8   :  { %v452_v47 = vrot.slane %v448_v39, 7 }
 0x3b9   :  { %v446_v23 = vpop.permute.xlu1 %445  ;;  %v438_v46 = vadd.f32 %v434_v38, %v856_v36 }
 0x3ba   :  { %v449_v24 = vmul.f32 %v446_v23, %v848_v25  ;;  %v482_v29 = vpop.permute.xlu0 %481 }
 0x3bb   :  { %v485_v33 = vmul.f32 %v482_v29, %v853_v34  ;;  %v456_v52 = vadd.f32 %v452_v47, %v438_v46 }
 0x3bc   :  { %v453_v30 = vrot.slane %v449_v24, 7 }
 0x3bd   :  { %v489_v43 = vrot.slane %v485_v33, 7 }
 0x3be   :  { %v464_v31 = vpop.permute.xlu1 %463  ;;  %v457_v40 = vadd.f32 %v453_v30, %v439_v32 }
 0x3bf   :  { %v467_v35 = vmul.f32 %v464_v31, %v851_v27 }
 0x3c1   :  { %v471_v41 = vrot.slane %v467_v35, 7 }
 0x3c2   :  { %v460_v42 = vpop.permute.xlu1 %459 }
 0x3c3   :  { %v475_v44 = vadd.f32 %v471_v41, %v457_v40  ;;  %v466_v45 = vmul.f32 %v460_v42, %v851_v27 }
 0x3c5   :  { %v493_v48 = vadd.f32 %v489_v43, %v475_v44  ;;  %v470_v49 = vrot.slane %v466_v45, 7 }
 0x3c7   :  { %760 = vtanh.f32 %v493_v48  ;;  %v478_v51 = vpop.permute.xlu1 %477  ;;  %v474_v54 = vadd.f32 %v470_v49, %v456_v52 }
 0x3c8   :  { %v484_v53 = vmul.f32 %v478_v51, %v853_v34 }
 0x3ca   :  { %v488_v55 = vrot.slane %v484_v53, 7 }
 0x3cc   :  { %v492_v56 = vadd.f32 %v488_v55, %v474_v54 }
 0x3ce   :  { %762 = vtanh.f32 %v492_v56 }
 0x3d1   :  { %v761_v57 = vpop.eup %760 }
 0x3d2   :  { %498 = vst.msk [vmem:[%s1045_s3 + $0x8] sm:$0x20] %vm496_vm5, %v761_v57  ;;  %506 = vperm.xlu1 %726, %v761_v57  }
 0x3d6   :  { %728 = vset.pattern.permute.xlu1 %v797_v3 }
 0x3d7   :  { %524 = vperm.xlu1 %728, %v761_v57  }
 0x3d8   :  { %v763_v58 = vpop.eup %762 }
 0x3d9   :  { %497 = vst.msk [vmem:[%s1045_s3] sm:$0x20] %vm496_vm5, %v763_v58  ;;  %501 = vperm.xlu0 %727, %v763_v58  }
 0x3db   :  { %520 = vperm.xlu1 %728, %v763_v58  }
 0x3dd   :  { %729 = vset.pattern.permute.xlu0 %v798_v4 }
 0x3de   :  { %542 = vperm.xlu0 %729, %v761_v57  }
 0x3df   :  { %730 = vset.pattern.permute.xlu1 %v798_v4 }
 0x3e0   :  { %538 = vperm.xlu1 %730, %v763_v58  }
 0x3e2   :  { %732 = vset.pattern.permute.xlu0 %v799_v50 }
 0x3e3   :  { %556 = vperm.xlu0 %732, %v763_v58  }
 0x3e4   :  { %731 = vset.pattern.permute.xlu1 %v799_v50 }
 0x3e5   :  { %560 = vperm.xlu1 %731, %v761_v57  }
 0x3e7   :  { %734 = vset.pattern.permute.xlu0 %v797_v3 }
 0x3e9   :  { %733 = vset.pattern.permute.xlu1 %v796_v2 }
 0x451   :  { %v507_v59 = vpop.permute.xlu1 %506 }
 0x452   :  { %v510_v0 = vmul.f32 %v507_v59, %v846_v18 }
 0x454   :  { %v514_v10 = vrot.slane %v510_v0, 7 }
 0x456   :  { %v525_v60 = vpop.permute.xlu1 %524  ;;  %v518_v17 = vadd.f32 %v514_v10, %v858_v37 }
 0x457   :  { %v528_v6 = vmul.f32 %v525_v60, %v848_v25 }
 0x458   :  { %v502_v61 = vpop.permute.xlu0 %501 }
 0x459   :  { %v509_v62 = vmul.f32 %v502_v61, %v846_v18  ;;  %v532_v13 = vrot.slane %v528_v6, 7 }
 0x45a   :  { %v521_v63 = vpop.permute.xlu1 %520 }
 0x45b   :  { %v513_v1 = vrot.slane %v509_v62, 7  ;;  %v527_v5 = vmul.f32 %v521_v63, %v848_v25  ;;  %v536_v23 = vadd.f32 %v532_v13, %v518_v17 }
 0x45d   :  { %v543_v7 = vpop.permute.xlu0 %542  ;;  %v517_v8 = vadd.f32 %v513_v1, %v856_v36  ;;  %v531_v9 = vrot.slane %v527_v5, 7 }
 0x45e   :  { %v546_v2 = vmul.f32 %v543_v7, %v851_v27 }
 0x45f   :  { %v539_v11 = vpop.permute.xlu1 %538  ;;  %v535_v14 = vadd.f32 %v531_v9, %v517_v8 }
 0x460   :  { %v545_v12 = vmul.f32 %v539_v11, %v851_v27  ;;  %v550_v19 = vrot.slane %v546_v2, 7 }
 0x462   :  { %v549_v15 = vrot.slane %v545_v12, 7  ;;  %v557_v16 = vpop.permute.xlu0 %556  ;;  %v554_v28 = vadd.f32 %v550_v19, %v536_v23 }
 0x463   :  { %v563_v20 = vmul.f32 %v557_v16, %v853_v34 }
 0x464   :  { %v553_v21 = vadd.f32 %v549_v15, %v535_v14  ;;  %v561_v22 = vpop.permute.xlu1 %560 }
 0x465   :  { %v567_v24 = vrot.slane %v563_v20, 7  ;;  %v564_v26 = vmul.f32 %v561_v22, %v853_v34 }
 0x467   :  { %v571_v29 = vadd.f32 %v567_v24, %v553_v21  ;;  %v568_v30 = vrot.slane %v564_v26, 7 }
 0x469   :  { %764 = vtanh.f32 %v571_v29  ;;  %v572_v31 = vadd.f32 %v568_v30, %v554_v28 }
 0x46b   :  { %766 = vtanh.f32 %v572_v31 }
 0x473   :  { %v765_v32 = vpop.eup %764 }
 0x474   :  { %576 = vst.msk [vmem:[%s1045_s3] sm:$0x40] %vm575_vm6, %v765_v32 }
 0x475   :  { %v767_v33 = vpop.eup %766 }
 0x476   :  { %577 = vst.msk [vmem:[%s1045_s3 + $0x8] sm:$0x40] %vm575_vm6, %v767_v33  ;;  %603 = vperm.xlu0 %734, %v767_v33   ;;  %585 = vperm.xlu1 %733, %v767_v33  }
 0x47a   :  { %737 = vset.pattern.permute.xlu0 %v798_v4  ;;  %580 = vperm.xlu1 %733, %v765_v32  }
 0x47b   :  { %617 = vperm.xlu0 %737, %v765_v32  }
 0x47e   :  { %735 = vset.pattern.permute.xlu1 %v797_v3 }
 0x47f   :  { %599 = vperm.xlu1 %735, %v765_v32   ;;  %739 = vset.pattern.permute.xlu0 %v799_v50 }
 0x483   :  { %736 = vset.pattern.permute.xlu1 %v798_v4 }
 0x484   :  { %621 = vperm.xlu1 %736, %v767_v33  }
 0x488   :  { %738 = vset.pattern.permute.xlu1 %v799_v50 }
 0x489   :  { %639 = vperm.xlu1 %738, %v767_v33  }
 0x48d   :  { %635 = vperm.xlu1 %738, %v765_v32  }
 0x4f5   :  { %v586_v35 = vpop.permute.xlu1 %585  ;;  %v604_v41 = vpop.permute.xlu0 %603 }
 0x4f6   :  { %v589_v39 = vmul.f32 %v586_v35, %v846_v18  ;;  %v607_v3 = vmul.f32 %v604_v41, %v848_v25 }
 0x4f8   :  { %v593_v42 = vrot.slane %v589_v39, 7  ;;  %v611_v48 = vrot.slane %v607_v3, 7 }
 0x4f9   :  { %v581_v38 = vpop.permute.xlu1 %580 }
 0x4fa   :  { %v588_v43 = vmul.f32 %v581_v38, %v846_v18  ;;  %v597_v50 = vadd.f32 %v593_v42, %v858_v37  ;;  %v618_v47 = vpop.permute.xlu0 %617 }
 0x4fb   :  { %v624_v54 = vmul.f32 %v618_v47, %v851_v27 }
 0x4fc   :  { %v592_v46 = vrot.slane %v588_v43, 7  ;;  %v615_v18 = vadd.f32 %v611_v48, %v597_v50 }
 0x4fd   :  { %v628_v59 = vrot.slane %v624_v54, 7 }
 0x4fe   :  { %v600_v40 = vpop.permute.xlu1 %599  ;;  %v596_v53 = vadd.f32 %v592_v46, %v856_v36 }
 0x4ff   :  { %v606_v44 = vmul.f32 %v600_v40, %v848_v25 }
 0x501   :  { %v610_v49 = vrot.slane %v606_v44, 7 }
 0x503   :  { %v622_v45 = vpop.permute.xlu1 %621  ;;  %v614_v56 = vadd.f32 %v610_v49, %v596_v53 }
 0x504   :  { %v625_v4 = vmul.f32 %v622_v45, %v851_v27 }
 0x505   :  { %v632_v61 = vadd.f32 %v628_v59, %v614_v56 }
 0x506   :  { %v629_v51 = vrot.slane %v625_v4, 7 }
 0x508   :  { %v640_v52 = vpop.permute.xlu1 %639  ;;  %v633_v25 = vadd.f32 %v629_v51, %v615_v18 }
 0x509   :  { %v643_v55 = vmul.f32 %v640_v52, %v853_v34 }
 0x50b   :  { %v647_v57 = vrot.slane %v643_v55, 7 }
 0x50c   :  { %v636_v58 = vpop.permute.xlu1 %635 }
 0x50d   :  { %v651_v60 = vadd.f32 %v647_v57, %v633_v25  ;;  %v642_v37 = vmul.f32 %v636_v58, %v853_v34 }
 0x50f   :  { %768 = vtanh.f32 %v651_v60  ;;  %v646_v62 = vrot.slane %v642_v37, 7 }
 0x511   :  { %v650_v63 = vadd.f32 %v646_v62, %v632_v61 }
 0x513   :  { %770 = vtanh.f32 %v650_v63 }
 0x519   :  { %v769_v36 = vpop.eup %768 }
 0x51a   :  { %656 = vst.msk [vmem:[%s1045_s3 + $0x8] sm:$0x80] %vm654_vm7, %v769_v36  ;;  %v659_v27 = vrot.slane %v769_v36, 7 }
 0x51c   :  { %663 = vst.msk [vmem:[#allocation2 + $0x1] sm:$0x1] %vm101_vm0, %v659_v27 }
 0x51d   :  { %v771_v0 = vpop.eup %770 }
 0x51e   :  { %655 = vst.msk [vmem:[%s1045_s3] sm:$0x80] %vm654_vm7, %v771_v0  ;;  %662 = vst.msk [vmem:[#allocation2 - $0x7] sm:$0x80] %vm654_vm7, %v771_v0 }
 0x51f   :  { %783 = shalt.err (!%p780_p4)
}
 0x520   :  { %s784_s28 = scalar_lea.hbm %s1046_s4, 32 }
 0x521   :  { %p785_p5 = scmp.ne.s32.totalorder %s1046_s4, %s784_s28  ;;  %p788_p6 = scmp.lt.u32.totalorder %s784_s28, %s1046_s4 }
 0x523   :  { %p790_p7 = pnand %p788_p6, %p785_p5 }
 0x525   :  { %793 = shalt.err (!%p790_p7)
}
 0x526   :  { %675 = dma.vmem_to_hbm [thread:$0]  %s673_s1, 32, %s1046_s4, [#allocation3]  }
 0x527   :  { %794 = dma.done.wait [#allocation3], 32  }
 0x528   :  { %795 = vsyncadd [#allocation3], 4294967264 }
 0x529   :  { %681 = vsyncpa [#allocation3], 1 }

</bundles_post_ra>
